<compile_context>
chip_gen: v7x
topology: tpu7x:2x2x1
jax: 0.10.0
libtpu: 0.0.40
codegen_flags: <defaults>
</compile_context>

<pallas_src>
import functools

import jax
import jax.numpy as jnp
from jax import lax
from jax.experimental import pallas as pl
from jax.experimental.pallas import tpu as pltpu

_NEG_BIG = -1e30          # fills padded vocab columns via the output bias


# ---------------------------------------------------------------------------
# small helpers
# ---------------------------------------------------------------------------
def _round_up(x, m):
    return (x + m - 1) // m * m


def _pad_axis(a, axis, new_size, value=0.0):
    if a.shape[axis] == new_size:
        return a
    pads = [(0, 0)] * a.ndim
    pads[axis] = (0, new_size - a.shape[axis])
    return jnp.pad(a, pads, constant_values=value)


def _vmem_working_budget():
    """Byte budget for one stage's VMEM working set (tiles + resident weights)."""
    cap = None
    try:  # per-generation sizing: v5e/v6e 128 MiB, v7x 64 MiB
        cap = getattr(pltpu.get_tpu_info(), "vmem_capacity_bytes", None)
    except Exception:
        cap = None
    if not cap:
        cap = 64 * 2 ** 20                      # assume the smallest generation
    return int(min(max(0.30 * cap, 8 * 2 ** 20), 40 * 2 ** 20))


def _vmem_limit_bytes(budget):
    # Explicit scoped-VMEM limit: ~2x the working-set budget, clamped above the
    # v5e 16 MiB default and safely below v7x's 64 MiB physical VMEM.
    return int(min(max(2 * budget, 32 * 2 ** 20), 56 * 2 ** 20))


def _fit_tile(total, unit, avail_bytes, bytes_per_unit, cap):
    """Largest tile (multiple of `unit`, <= cap) whose streaming bytes fit."""
    t = max(unit, int(avail_bytes) // max(int(bytes_per_unit), 1) // unit * unit)
    t = min(t, max(unit, cap // unit * unit), _round_up(total, unit))
    return int(t)


def _weight_spec(block_shape, index_map, single_buffer):
    # Grid-invariant operands (index_map always returns the same block): a single
    # VMEM buffer suffices -- no re-DMA ever happens -- halving their footprint
    # vs. the default double buffering.
    if single_buffer:
        return pl.BlockSpec(block_shape, index_map, pipeline_mode=pl.Buffered(1))
    return pl.BlockSpec(block_shape, index_map)


# ---------------------------------------------------------------------------
# kernel 1: row-tiled matmul + bias (input projection / gate table build)
# ---------------------------------------------------------------------------
def _matmul_bias_kernel(x_ref, w_ref, b_ref, o_ref):
    x = x_ref[...].astype(w_ref.dtype)
    acc = jnp.dot(x, w_ref[...], preferred_element_type=jnp.float32)
    o_ref[...] = (acc + b_ref[...].astype(jnp.float32)).astype(o_ref.dtype)


def _matmul_bias(x, w, b, *, out_dtype, budget, single_buffer):
    """(rows, K) @ (K, N) + b, rows padded internally to the row tile."""
    rows, K = x.shape
    N = w.shape[1]
    wbytes = jnp.dtype(w.dtype).itemsize
    obytes = jnp.dtype(out_dtype).itemsize
    fixed = (1 if single_buffer else 2) * K * N * wbytes + 2 * N * 4
    per_row = 2 * K * x.dtype.itemsize + 2 * N * obytes
    rt = _fit_tile(rows, 8, max(budget - fixed, per_row * 8), per_row, 512)
    rows_p = _round_up(rows, rt)
    xp = _pad_axis(x, 0, rows_p)
    out = pl.pallas_call(
        _matmul_bias_kernel,
        out_shape=jax.ShapeDtypeStruct((rows_p, N), out_dtype),
        grid_spec=pltpu.PrefetchScalarGridSpec(
            num_scalar_prefetch=0,
            grid=(rows_p // rt,),
            in_specs=[
                pl.BlockSpec((rt, K), lambda r: (r, 0)),
                _weight_spec((K, N), lambda r: (0, 0), single_buffer),
                _weight_spec((1, N), lambda r: (0, 0), single_buffer),
            ],
            out_specs=pl.BlockSpec((rt, N), lambda r: (r, 0)),
        ),
        compiler_params=pltpu.CompilerParams(
            dimension_semantics=("parallel",),
            vmem_limit_bytes=_vmem_limit_bytes(budget)),
    )(xp, w, b)
    return out[:rows]


# ---------------------------------------------------------------------------
# kernel 2: sequential LSTM recurrence (Tc timesteps per grid step,
#           batch-chunked on the leading "parallel" axis for v7x's 2 cores)
# ---------------------------------------------------------------------------
def _lstm_recurrent_kernel(gx_ref, whh_t_ref, h_out_ref, h_scr, c_scr, *,
                           per_gate):
    """gx_ref: (Tc, Bc, 4Hp) precomputed x@W_ih^T + b   (gate order i,f,g,o)
       whh_t_ref: (Hp, 4Hp)   h_out_ref: (Tc, Bc, Hp)   h_scr/c_scr: (Bc, Hp)"""
    @pl.when(pl.program_id(1) == 0)          # first time block of this batch chunk
    def _():
        h_scr[...] = jnp.zeros_like(h_scr)
        c_scr[...] = jnp.zeros_like(c_scr)

    Hp = h_scr.shape[-1]
    w_dtype = whh_t_ref.dtype
    if not per_gate:
        whh_t = whh_t_ref[...]               # hoisted; reused every inner step

    def step(tc, carry):
        h = h_scr[...]
        c = c_scr[...]
        hb = h.astype(w_dtype)
        if per_gate:
            # Per-gate dots keep the live value at (Bc, Hp) instead of (Bc, 4Hp),
            # bounding vreg pressure on the serial critical path for large Bc.
            def gate(g):
                return (gx_ref[tc, :, g * Hp:(g + 1) * Hp].astype(jnp.float32) +
                        jnp.dot(hb, whh_t_ref[:, g * Hp:(g + 1) * Hp],
                                preferred_element_type=jnp.float32))
            i_g = jax.nn.sigmoid(gate(0))
            f_g = jax.nn.sigmoid(gate(1))
            g_g = jnp.tanh(gate(2))
            o_g = jax.nn.sigmoid(gate(3))
        else:
            gates = (gx_ref[tc].astype(jnp.float32) +
                     jnp.dot(hb, whh_t, preferred_element_type=jnp.float32))
            # Hp is a multiple of 128, so every gate slice is lane-aligned.
            i_g = jax.nn.sigmoid(gates[:, 0 * Hp:1 * Hp])
            f_g = jax.nn.sigmoid(gates[:, 1 * Hp:2 * Hp])
            g_g = jnp.tanh(gates[:, 2 * Hp:3 * Hp])
            o_g = jax.nn.sigmoid(gates[:, 3 * Hp:4 * Hp])
        c_new = f_g * c + i_g * g_g
        h_new = o_g * jnp.tanh(c_new)
        h_scr[...] = h_new
        c_scr[...] = c_new
        h_out_ref[tc] = h_new.astype(h_out_ref.dtype)
        return carry

    lax.fori_loop(0, gx_ref.shape[0], step, 0, unroll=True)


# ---------------------------------------------------------------------------
# kernel 3: output projection with vocab-tiled online logsumexp
# ---------------------------------------------------------------------------
def _proj_lse_kernel(h_ref, w_ref, b_ref, logits_ref, lse_ref, m_scr, l_scr):
    v = pl.program_id(1)

    @pl.when(v == 0)
    def _():
        m_scr[...] = jnp.full_like(m_scr, -jnp.inf)
        l_scr[...] = jnp.zeros_like(l_scr)

    h = h_ref[...].astype(w_ref.dtype)
    logits = (jnp.dot(h, w_ref[...], preferred_element_type=jnp.float32)
              + b_ref[...])                        # bias is -1e30 in padded cols
    logits_ref[...] = logits

    m_prev = m_scr[...]
    m_new = jnp.maximum(m_prev, jnp.max(logits, axis=-1, keepdims=True))
    l_scr[...] = (l_scr[...] * jnp.exp(m_prev - m_new)
                  + jnp.sum(jnp.exp(logits - m_new), axis=-1, keepdims=True))
    m_scr[...] = m_new

    @pl.when(v == pl.num_programs(1) - 1)
    def _():
        lse_ref[...] = m_scr[...] + jnp.log(l_scr[...])


# ---------------------------------------------------------------------------
# full forward pass
# ---------------------------------------------------------------------------
def lstm_lm_forward(x_tokens, emb_w, w_ih, w_hh, b_ih, b_hh, w_out, b_out,
                    *, use_bf16=True, single_buffer_weights=True):
    B, T = x_tokens.shape
    V, D = emb_w.shape
    H = w_hh.shape[1]

    Bp = _round_up(B, 8)          # sublane-aligned batch (recurrent kernel only)
    Hp = _round_up(H, 128)        # lane-aligned hidden (per gate)
    budget = _vmem_working_budget()
    vlimit = _vmem_limit_bytes(budget)

    w_dt = jnp.bfloat16 if use_bf16 else jnp.float32      # MXU weights
    gx_dt = jnp.bfloat16 if use_bf16 else jnp.float32     # inter-stage tensors
    wbytes = jnp.dtype(w_dt).itemsize
    gxbytes = jnp.dtype(gx_dt).itemsize

    # --- weight prep: pad each gate block separately so gates stay aligned ---
    wih_t = _pad_axis(w_ih.reshape(4, H, D), 1, Hp).reshape(4 * Hp, D).T  # (D,4Hp)
    whh_t = _pad_axis(_pad_axis(w_hh.reshape(4, H, H), 1, Hp), 2, Hp)
    whh_t = whh_t.reshape(4 * Hp, Hp).T                                   # (Hp,4Hp)
    b_sum = _pad_axis((b_ih + b_hh).reshape(4, H), 1, Hp).reshape(1, 4 * Hp)
    wo_t = _pad_axis(w_out, 1, Hp).T                                      # (Hp, V)
    if use_bf16:
        wih_t = wih_t.astype(jnp.bfloat16)
        whh_t = whh_t.astype(jnp.bfloat16)
        wo_t = wo_t.astype(jnp.bfloat16)

    # --- stage 1: time-invariant input projection -------------------------
    # Flat (B*T) row order below is exactly PyTorch's x.view(T, B, -1) flat
    # reinterpretation, so a later reshape(T, B, ...) matches the reference.
    tokens_flat = x_tokens.reshape(-1)
    use_table = (V * 4 * Hp * gxbytes <= 256 * 2 ** 20) and (D < 128)
    if use_table:
        # Fold the projection into the embedding: one (V, 4Hp) table + a gather,
        # avoiding a T*B-row matmul whose contraction depth is only D (<128).
        table = _matmul_bias(emb_w, wih_t, b_sum, out_dtype=gx_dt,
                             budget=budget, single_buffer=single_buffer_weights)
        gates_flat = jnp.take(table, tokens_flat, axis=0)          # (B*T, 4Hp)
    else:
        xs_flat = jnp.take(emb_w, tokens_flat, axis=0)             # (B*T, D)
        gates_flat = _matmul_bias(xs_flat, wih_t, b_sum, out_dtype=gx_dt,
                                  budget=budget,
                                  single_buffer=single_buffer_weights)

    gates_x = gates_flat.reshape(T, B, 4 * Hp)
    gates_x = _pad_axis(gates_x, 1, Bp)                            # (T, Bp, 4Hp)

    # --- stage 2: sequential recurrence ------------------------------------
    # Batch-chunk leading axis ("parallel") lets v7x's two TensorCores each run
    # half of the independent-per-row recurrences; single-core chips just loop.
    Bc = Bp // 2 if (Bp >= 16 and Bp % 16 == 0) else Bp
    n_bchunk = Bp // Bc

    per_tc = 2 * Bc * 4 * Hp * gxbytes + 2 * Bc * Hp * gxbytes     # gx + h_out
    fixed = ((1 if single_buffer_weights else 2) * Hp * 4 * Hp * wbytes
             + 2 * Bc * Hp * 4)                                    # whh + h/c scratch
    Tc = _fit_tile(T, 1, max(budget - fixed, per_tc), per_tc, 16)
    Tp = _round_up(T, Tc)
    gates_x = _pad_axis(gates_x, 0, Tp)                            # pad time to Tc

    h_all = pl.pallas_call(
        functools.partial(_lstm_recurrent_kernel, per_gate=Bc >= 32),
        out_shape=jax.ShapeDtypeStruct((Tp, Bp, Hp), gx_dt),
        grid_spec=pltpu.PrefetchScalarGridSpec(
            num_scalar_prefetch=0,
            grid=(n_bchunk, Tp // Tc),
            in_specs=[
                pl.BlockSpec((Tc, Bc, 4 * Hp), lambda bc, s: (s, bc, 0)),
                _weight_spec((Hp, 4 * Hp), lambda bc, s: (0, 0),
                             single_buffer_weights),
            ],
            out_specs=pl.BlockSpec((Tc, Bc, Hp), lambda bc, s: (s, bc, 0)),
            scratch_shapes=[
                pltpu.VMEM((Bc, Hp), jnp.float32),     # h state (kept f32)
                pltpu.VMEM((Bc, Hp), jnp.float32),     # c state (kept f32)
            ],
        ),
        compiler_params=pltpu.CompilerParams(
            dimension_semantics=("parallel", "arbitrary"),  # time is truly serial
            vmem_limit_bytes=vlimit),
    )(gates_x, whh_t)

    # --- stage 3: output projection + vocab-tiled online logsumexp ----------
    rows = T * B
    h_flat = h_all[:T, :B].reshape(rows, Hp)       # drop padded time/batch rows

    Vp0 = _round_up(V, 128)
    tv = _fit_tile(Vp0, 128, budget // 2, 2 * Hp * wbytes, 2048)
    Vp = _round_up(V, tv)
    per_row = 2 * Hp * gxbytes + 2 * tv * 4 + 16
    rt = _fit_tile(rows, 8,
                   max(budget - 2 * Hp * tv * wbytes - 2 * tv * 4, per_row * 8),
                   per_row, 512)
    rows_p = _round_up(rows, rt)
    h_flat = _pad_axis(h_flat, 0, rows_p)

    wo_t = _pad_axis(wo_t, 1, Vp)                                   # zero weights
    bo = _pad_axis(b_out.astype(jnp.float32), 0, Vp,
                   value=_NEG_BIG).reshape(1, Vp)                   # -1e30 pad cols

    logits_p, lse_p = pl.pallas_call(
        _proj_lse_kernel,
        out_shape=(jax.ShapeDtypeStruct((rows_p, Vp), jnp.float32),
                   jax.ShapeDtypeStruct((rows_p, 1), jnp.float32)),
        grid_spec=pltpu.PrefetchScalarGridSpec(
            num_scalar_prefetch=0,
            grid=(rows_p // rt, Vp // tv),
            in_specs=[
                pl.BlockSpec((rt, Hp), lambda r, v: (r, 0)),
                pl.BlockSpec((Hp, tv), lambda r, v: (0, v)),
                pl.BlockSpec((1, tv), lambda r, v: (0, v)),
            ],
            out_specs=(pl.BlockSpec((rt, tv), lambda r, v: (r, v)),
                       pl.BlockSpec((rt, 1), lambda r, v: (r, 0))),
            scratch_shapes=[pltpu.VMEM((rt, 1), jnp.float32),       # running max
                            pltpu.VMEM((rt, 1), jnp.float32)],      # running sum
        ),
        compiler_params=pltpu.CompilerParams(
            dimension_semantics=("parallel", "arbitrary"),
            vmem_limit_bytes=vlimit),
    )(h_flat, wo_t, bo)

    # Cheap epilogue: normalize by the online logsumexp and drop the padding.
    logp = logits_p[:rows, :V] - lse_p[:rows]
    return logp.reshape(T, B, V)


def _run_forward(*args, **kwargs):
    # pl.Buffered(1) (single-buffered invariant weights) is the preferred path;
    # fall back to default double buffering if this JAX build rejects it.
    try:
        return jax.block_until_ready(
            lstm_lm_forward(*args, single_buffer_weights=True, **kwargs))
    except Exception:
        return jax.block_until_ready(
            lstm_lm_forward(*args, single_buffer_weights=False, **kwargs))


# ---------------------------------------------------------------------------
# pure-JAX reference (matches torch.nn.LSTM / Linear / log_softmax)
# ---------------------------------------------------------------------------
def reference_forward(x_tokens, emb_w, w_ih, w_hh, b_ih, b_hh, w_out, b_out):
    B, T = x_tokens.shape
    xs = jnp.take(emb_w, x_tokens, axis=0).reshape(T, B, emb_w.shape[1])
    H = w_hh.shape[1]

    def step(carry, x_t):
        h, c = carry
        gates = x_t @ w_ih.T + b_ih + h @ w_hh.T + b_hh
        i_g, f_g, g_g, o_g = jnp.split(gates, 4, axis=-1)
        i_g = jax.nn.sigmoid(i_g)
        f_g = jax.nn.sigmoid(f_g)
        g_g = jnp.tanh(g_g)
        o_g = jax.nn.sigmoid(o_g)
        c = f_g * c + i_g * g_g
        h = o_g * jnp.tanh(c)
        return (h, c), h

    init = (jnp.zeros((B, H), jnp.float32), jnp.zeros((B, H), jnp.float32))
    _, hs = lax.scan(step, init, xs)                 # (T, B, H)
    logits = hs @ w_out.T + b_out                    # (T, B, V)
    return jax.nn.log_softmax(logits, axis=-1)


if __name__ == "__main__":
    # Small deterministic setup mirroring LSTMLM.__init__ shapes:
    #   V = vocab, D = embedding dim, H = hidden_dim, B = btch_sz, T = seq len
    V, D, H = 50, 16, 32
    B, T = 2, 8

    key = jax.random.PRNGKey(0)
    k_emb, k_wih, k_whh, k_bih, k_bhh, k_wo, k_bo, k_x = jax.random.split(key, 8)

    emb_w = jax.random.normal(k_emb, (V, D), jnp.float32) * 0.1     # Embedding
    w_ih = jax.random.normal(k_wih, (4 * H, D), jnp.float32) * 0.1  # weight_ih_l0
    w_hh = jax.random.normal(k_whh, (4 * H, H), jnp.float32) * 0.1  # weight_hh_l0
    b_ih = jax.random.normal(k_bih, (4 * H,), jnp.float32) * 0.1    # bias_ih_l0
    b_hh = jax.random.normal(k_bhh, (4 * H,), jnp.float32) * 0.1    # bias_hh_l0
    w_out = jax.random.normal(k_wo, (V, H), jnp.float32) * 0.1      # Linear.weight
    b_out = jax.random.normal(k_bo, (V,), jnp.float32) * 0.1        # Linear.bias

    x_tokens = jax.random.randint(k_x, (B, T), 0, V, dtype=jnp.int32)
    args = (x_tokens, emb_w, w_ih, w_hh, b_ih, b_hh, w_out, b_out)

    ref = jax.block_until_ready(reference_forward(*args))

    # Strict check: all-f32 path must match the f32 reference tightly.
    out_f32 = _run_forward(*args, use_bf16=False)
    assert out_f32.shape == (T, B, V), out_f32.shape
    assert jnp.allclose(out_f32, ref, atol=1e-3, rtol=1e-3), (
        float(jnp.max(jnp.abs(out_f32 - ref))))

    # Default (recommended) path: bf16 MXU weights + bf16 inter-stage tensors,
    # f32 accumulation and f32 h/c state -- relaxed tolerance vs the f32 ref.
    out = _run_forward(*args)
    assert out.shape == (T, B, V), out.shape
    assert jnp.allclose(out, ref, atol=5e-2, rtol=5e-2), (
        float(jnp.max(jnp.abs(out - ref))))

    print("KERNEL_OK")
</pallas_src>

<mosaic_0001>
module attributes {stable_mosaic.version = 11 : i64} {
  func.func @_matmul_bias_kernel(%arg0: i32, %arg1: memref<56x16xf32, #tpu.memory_space<vmem>>, %arg2: memref<16x512xf32, #tpu.memory_space<vmem>>, %arg3: memref<1x512xf32, #tpu.memory_space<vmem>>, %arg4: memref<56x512xf32, #tpu.memory_space<vmem>>) attributes {dimension_semantics = [#tpu.dimension_semantics<parallel>], iteration_bounds = array<i64: 1>, scalar_prefetch = 0 : i64, scratch_operands = 0 : i64, tpu.core_type = #tpu.core_type<tc>, window_params = [{transform_indices = @transform_0, window_bounds = array<i64: 56, 16>}, {pipeline_mode = #tpu.pipeline_mode<synchronous>, transform_indices = @transform_1, window_bounds = array<i64: 16, 512>}, {pipeline_mode = #tpu.pipeline_mode<synchronous>, transform_indices = @transform_2, window_bounds = array<i64: 1, 512>}, {transform_indices = @transform_3, window_bounds = array<i64: 56, 512>}]} {
    %c0 = arith.constant 0 : index
    %c0_0 = arith.constant 0 : index
    %0 = vector.load %arg1[%c0, %c0_0] : memref<56x16xf32, #tpu.memory_space<vmem>>, vector<56x16xf32>
    %c0_1 = arith.constant 0 : index
    %c0_2 = arith.constant 0 : index
    %1 = vector.load %arg2[%c0_1, %c0_2] : memref<16x512xf32, #tpu.memory_space<vmem>>, vector<16x512xf32>
    %cst = arith.constant dense<0.000000e+00> : vector<56x512xf32>
    %2 = tpu.matmul %0, %1, %cst {dimension_numbers = #tpu.dot_dimension_numbers<[1], [0], [0], [1], [0, 0, 1, 1], [], []>} : vector<56x16xf32>, vector<16x512xf32>, vector<56x512xf32> -> vector<56x512xf32>
    %c0_3 = arith.constant 0 : index
    %c0_4 = arith.constant 0 : index
    %3 = vector.load %arg3[%c0_3, %c0_4] : memref<1x512xf32, #tpu.memory_space<vmem>>, vector<1x512xf32>
    %4 = vector.broadcast %3 : vector<1x512xf32> to vector<56x512xf32>
    %5 = arith.addf %2, %4 : vector<56x512xf32>
    %c0_5 = arith.constant 0 : index
    %c0_6 = arith.constant 0 : index
    %6 = vector.load %arg4[%c0_5, %c0_6] : memref<56x512xf32, #tpu.memory_space<vmem>>, vector<56x512xf32>
    tpu.vector_store %arg4[%c0_5, %c0_6], %5 {strides = array<i32>} : memref<56x512xf32, #tpu.memory_space<vmem>>, vector<56x512xf32>,
    return
  }
  func.func @transform_0(%arg0: i32) -> (i32, i32) {
    %c0_i32 = arith.constant 0 : i32
    %c0_i32_0 = arith.constant 0 : i32
    return %arg0, %c0_i32 : i32, i32
  }
  func.func @transform_1(%arg0: i32) -> (i32, i32) {
    %c0_i32 = arith.constant 0 : i32
    %c0_i32_0 = arith.constant 0 : i32
    %c0_i32_1 = arith.constant 0 : i32
    return %c0_i32, %c0_i32_0 : i32, i32
  }
  func.func @transform_2(%arg0: i32) -> (i32, i32) {
    %c0_i32 = arith.constant 0 : i32
    %c0_i32_0 = arith.constant 0 : i32
    %c0_i32_1 = arith.constant 0 : i32
    return %c0_i32, %c0_i32_0 : i32, i32
  }
  func.func @transform_3(%arg0: i32) -> (i32, i32) {
    %c0_i32 = arith.constant 0 : i32
    %c0_i32_0 = arith.constant 0 : i32
    return %arg0, %c0_i32 : i32, i32
  }
}

module attributes {stable_mosaic.version = 11 : i64} {
  func.func @_matmul_bias_kernel(%arg0: i32, %arg1: memref<56x16xf32, #tpu.memory_space<vmem>>, %arg2: memref<16x512xf32, #tpu.memory_space<vmem>>, %arg3: memref<1x512xf32, #tpu.memory_space<vmem>>, %arg4: memref<56x512xf32, #tpu.memory_space<vmem>>) attributes {dimension_semantics = [#tpu.dimension_semantics<parallel>], iteration_bounds = array<i64: 1>, scalar_prefetch = 0 : i64, scratch_operands = 0 : i64, tpu.core_type = #tpu.core_type<tc>, window_params = [{transform_indices = @transform_0, window_bounds = array<i64: 56, 16>}, {pipeline_mode = #tpu.pipeline_mode<synchronous>, transform_indices = @transform_1, window_bounds = array<i64: 16, 512>}, {pipeline_mode = #tpu.pipeline_mode<synchronous>, transform_indices = @transform_2, window_bounds = array<i64: 1, 512>}, {transform_indices = @transform_3, window_bounds = array<i64: 56, 512>}]} {
    %c0 = arith.constant 0 : index
    %c0_0 = arith.constant 0 : index
    %0 = vector.load %arg1[%c0, %c0_0] : memref<56x16xf32, #tpu.memory_space<vmem>>, vector<56x16xf32>
    %c0_1 = arith.constant 0 : index
    %c0_2 = arith.constant 0 : index
    %1 = vector.load %arg2[%c0_1, %c0_2] : memref<16x512xf32, #tpu.memory_space<vmem>>, vector<16x512xf32>
    %cst = arith.constant dense<0.000000e+00> : vector<56x512xf32>
    %2 = tpu.matmul %0, %1, %cst {dimension_numbers = #tpu.dot_dimension_numbers<[1], [0], [0], [1], [0, 0, 1, 1], [], []>} : vector<56x16xf32>, vector<16x512xf32>, vector<56x512xf32> -> vector<56x512xf32>
    %c0_3 = arith.constant 0 : index
    %c0_4 = arith.constant 0 : index
    %3 = vector.load %arg3[%c0_3, %c0_4] : memref<1x512xf32, #tpu.memory_space<vmem>>, vector<1x512xf32>
    %4 = vector.broadcast %3 : vector<1x512xf32> to vector<56x512xf32>
    %5 = arith.addf %2, %4 : vector<56x512xf32>
    %c0_5 = arith.constant 0 : index
    %c0_6 = arith.constant 0 : index
    %6 = vector.load %arg4[%c0_5, %c0_6] : memref<56x512xf32, #tpu.memory_space<vmem>>, vector<56x512xf32>
    tpu.vector_store %arg4[%c0_5, %c0_6], %5 {strides = array<i32>} : memref<56x512xf32, #tpu.memory_space<vmem>>, vector<56x512xf32>,
    return
  }
  func.func @transform_0(%arg0: i32) -> (i32, i32) {
    %c0_i32 = arith.constant 0 : i32
    %c0_i32_0 = arith.constant 0 : i32
    return %arg0, %c0_i32 : i32, i32
  }
  func.func @transform_1(%arg0: i32) -> (i32, i32) {
    %c0_i32 = arith.constant 0 : i32
    %c0_i32_0 = arith.constant 0 : i32
    %c0_i32_1 = arith.constant 0 : i32
    return %c0_i32, %c0_i32_0 : i32, i32
  }
  func.func @transform_2(%arg0: i32) -> (i32, i32) {
    %c0_i32 = arith.constant 0 : i32
    %c0_i32_0 = arith.constant 0 : i32
    %c0_i32_1 = arith.constant 0 : i32
    return %c0_i32, %c0_i32_0 : i32, i32
  }
  func.func @transform_3(%arg0: i32) -> (i32, i32) {
    %c0_i32 = arith.constant 0 : i32
    %c0_i32_0 = arith.constant 0 : i32
    return %arg0, %c0_i32 : i32, i32
  }
}

</mosaic_0001>

<bundles_post_ra>
// kernel: tpu_custom_call.1
= control target key start
LH: loop header
LB: loop body
LE: loop exit
PB: predicated region body
PF: predicated region fallthrough
CT: control target
= control target key end

     0   :  { %v382_v7 = vmov 0.0   ;;  %vm52_vm0 = vcmask 130048   ;;  %s516_s0 = inlined_call_operand.vmem [shape: f32[56,16], index: 0, kind: input, shape index: {}]   ;;  %s517_s1 = inlined_call_operand.vmem [shape: f32[16,512], index: 1, kind: input, shape index: {}]   ;;  %s518_s2 = inlined_call_operand.vmem [shape: f32[1,512], index: 2, kind: input, shape index: {}]   ;;  %s519_s3 = inlined_call_operand.hbm [shape: f32[56,512], index: 3, kind: output, shape index: {}]  }
   0x1   :  { %v23_v0 = vld [vmem:[%s517_s1 + $0x8] sm:$0xff]  ;;  %v25_v2 = vld [vmem:[%s517_s1 + $0x18] sm:$0xff]  ;;  %v22_v5 = vld [vmem:[%s517_s1] sm:$0xff]  ;;  %138 = vmatprep.mubr.f32.mxu0 %v382_v7  ;;  %245 = vmatprep.mubr.f32.mxu1 %v382_v7 }
   0x2   :  { %v27_v1 = vld [vmem:[%s517_s1 + $0x28] sm:$0xff]  ;;  %v29_v4 = vld [vmem:[%s517_s1 + $0x38] sm:$0xff]  ;;  %v26_v6 = vld [vmem:[%s517_s1 + $0x20] sm:$0xff] }
   0x3   :  { %v346_v3 = vpack.c.bf16 %v27_v1, %v23_v0  ;;  %v350_v8 = vpack.c.bf16 %v29_v4, %v25_v2  ;;  %v348_v9 = vpack.c.bf16 %v26_v6, %v22_v5  ;;  %v24_v10 = vld [vmem:[%s517_s1 + $0x10] sm:$0xff]  ;;  %v15_v13 = vld [vmem:[%s516_s0] sm:$0xff] }
   0x4   :  { %v28_v11 = vld [vmem:[%s517_s1 + $0x30] sm:$0xff] }
   0x5   :  { %347 = vmatprep.subr.bf16.mxu0 %v346_v3  ;;  %v352_v12 = vpack.c.bf16 %v28_v11, %v24_v10  ;;  %351 = vmatprep.subr.bf16.mxu1 %v350_v8 }
   0x6   :  { %349 = vmatpush1.bf16.msra.mxu0 %v348_v9 }
   0x7   :  { %353 = vmatpush1.bf16.msra.mxu1 %v352_v12 }
   0x8   :  { %8 = vsyncpa [#allocation3], 0  ;;  %v16_v14 = vld [vmem:[%s516_s0 + $0x8] sm:$0xff]  ;;  %v17_v15 = vld [vmem:[%s516_s0 + $0x10] sm:$0xff]  ;;  %v32_v20 = vlaneseq }
   0x9   :  { %332 = vmatmul.mubr.msk.f32.vlgmr.msra.gmra.mrb[0].mxu0 %vm52_vm0, %v15_v13  ;;  %v18_v16 = vld [vmem:[%s516_s0 + $0x18] sm:$0xff]  ;;  %v19_v17 = vld [vmem:[%s516_s0 + $0x20] sm:$0xff]  ;;  %v20_v18 = vld [vmem:[%s516_s0 + $0x28] sm:$0xff] }
   0xa   :  { %339 = vmatmul.mubr.msk.f32.vlgmr.msra.gmra.mrb[0].mxu1 %vm52_vm0, %v15_v13  ;;  %144 = vmatprep.mubr.f32.mxu0 %v382_v7  ;;  %v21_v19 = vld [vmem:[%s516_s0 + $0x30] sm:$0xff]  ;;  %v33_v21 = vshrl.u32 %v32_v20, 7  ;;  %v30_v23 = vld [vmem:[%s518_s2] sm:$0xf]  ;;  %s383_s0 = smov [#allocation2]  }
   0xb   :  { %251 = vmatprep.mubr.f32.mxu1 %v382_v7  ;;  %s321_s2 = sshll.u32 %s383_s0, 4  ;;  %s322_s2 = int_to_ptr.vmem [resolvable:$true] %s321_s2 }
   0xc   :  { %v34_v22 = vsub.s32 0, %v33_v21  ;;  %v42_v24 = vsub.s32 2, %v33_v21  ;;  %v38_v25 = vsub.s32 1, %v33_v21  ;;  %v46_v26 = vsub.s32 3, %v33_v21  ;;  %s358_s16 = scalar_lea.vmem %s322_s2, 3584  ;;  %p363_p1 = scmp.lt.s32.totalorder %s322_s2, %s322_s2 }
   0xd   :  { %333 = vmatmul.mubr.msk.f32.gmra.mrb[2].mxu0 %vm52_vm0, %v16_v14  ;;  %p359_p0 = scmp.ne.s32.totalorder %s322_s2, %s358_s16  ;;  %p364_p2 = scmp.lt.s32.totalorder %s358_s16, %s358_s16 }
   0xe   :  { %340 = vmatmul.mubr.msk.f32.gmra.mrb[2].mxu1 %vm52_vm0, %v16_v14  ;;  %150 = vmatprep.mubr.f32.mxu0 %v382_v7  ;;  %v468_v27 = vrot.slane %v30_v23, %v34_v22  ;;  %v470_v28 = vrot.slane %v30_v23, %v42_v24  ;;  %v472_v29 = vrot.slane %v30_v23, %v38_v25 }
   0xf   :  { %257 = vmatprep.mubr.f32.mxu1 %v382_v7  ;;  %v474_v30 = vrot.slane %v30_v23, %v46_v26  ;;  %p365_p3 = por %p364_p2, %p363_p1 }
  0x11   :  { %334 = vmatmul.mubr.msk.f32.gmra.mrb[4].mxu0 %vm52_vm0, %v17_v15  ;;  %p366_p4 = pnand %p365_p3, %p359_p0 }
  0x12   :  { %341 = vmatmul.mubr.msk.f32.gmra.mrb[4].mxu1 %vm52_vm0, %v17_v15  ;;  %156 = vmatprep.mubr.f32.mxu0 %v382_v7 }
  0x13   :  { %263 = vmatprep.mubr.f32.mxu1 %v382_v7 }
  0x15   :  { %335 = vmatmul.mubr.msk.f32.gmra.mrb[6].mxu0 %vm52_vm0, %v18_v16 }
  0x16   :  { %342 = vmatmul.mubr.msk.f32.gmra.mrb[6].mxu1 %vm52_vm0, %v18_v16  ;;  %162 = vmatprep.mubr.f32.mxu0 %v382_v7 }
  0x17   :  { %269 = vmatprep.mubr.f32.mxu1 %v382_v7 }
  0x19   :  { %336 = vmatmul.mubr.msk.f32.gmra.mrb[8].mxu0 %vm52_vm0, %v19_v17 }
  0x1a   :  { %343 = vmatmul.mubr.msk.f32.gmra.mrb[8].mxu1 %vm52_vm0, %v19_v17  ;;  %168 = vmatprep.mubr.f32.mxu0 %v382_v7 }
  0x1b   :  { %275 = vmatprep.mubr.f32.mxu1 %v382_v7 }
  0x1d   :  { %337 = vmatmul.mubr.msk.f32.gmra.mrb[10].mxu0 %vm52_vm0, %v20_v18 }
  0x1e   :  { %344 = vmatmul.mubr.msk.f32.gmra.mrb[10].mxu1 %vm52_vm0, %v20_v18  ;;  %174 = vmatprep.mubr.f32.mxu0 %v382_v7 }
  0x1f   :  { %281 = vmatprep.mubr.f32.mxu1 %v382_v7 }
  0x21   :  { %338 = vmatmul.mubr.msk.f32.gmra.mrb[12].mxu0 %vm52_vm0, %v21_v19 }
  0x22   :  { %345 = vmatmul.mubr.msk.f32.gmra.mrb[12].mxu1 %vm52_vm0, %v21_v19 }
  0xdc   :  { %v140_v31 = vpop.f32.mrb[0].mxu0 }
  0xdd   :  { %v141_v32 = vadd.f32 %v140_v31, %v468_v27  ;;  %v247_v33 = vpop.f32.mrb[0].mxu1  ;;  %v142_v34 = vpop.f32.mrb[1].mxu0 }
  0xde   :  { %v248_v35 = vadd.f32 %v247_v33, %v470_v28  ;;  %v143_v36 = vadd.f32 %v142_v34, %v472_v29  ;;  %v249_v37 = vpop.f32.mrb[1].mxu1 }
  0xdf   :  { %288 = vst [vmem:[#allocation2] sm:$0xff] %v141_v32  ;;  %v250_v38 = vadd.f32 %v249_v37, %v474_v30 }
  0xe0   :  { %290 = vst [vmem:[#allocation2 + $0x10] sm:$0xff] %v248_v35  ;;  %289 = vst [vmem:[#allocation2 + $0x8] sm:$0xff] %v143_v36  ;;  %v146_v39 = vpop.f32.mrb[2].mxu0 }
  0xe1   :  { %291 = vst [vmem:[#allocation2 + $0x18] sm:$0xff] %v250_v38  ;;  %v147_v40 = vadd.f32 %v146_v39, %v468_v27  ;;  %v253_v41 = vpop.f32.mrb[2].mxu1  ;;  %v148_v42 = vpop.f32.mrb[3].mxu0 }
  0xe2   :  { %v254_v43 = vadd.f32 %v253_v41, %v470_v28  ;;  %v149_v44 = vadd.f32 %v148_v42, %v472_v29  ;;  %v255_v45 = vpop.f32.mrb[3].mxu1 }
  0xe3   :  { %292 = vst [vmem:[#allocation2 + $0x20] sm:$0xff] %v147_v40  ;;  %v256_v46 = vadd.f32 %v255_v45, %v474_v30 }
  0xe4   :  { %294 = vst [vmem:[#allocation2 + $0x30] sm:$0xff] %v254_v43  ;;  %293 = vst [vmem:[#allocation2 + $0x28] sm:$0xff] %v149_v44  ;;  %v152_v47 = vpop.f32.mrb[4].mxu0 }
  0xe5   :  { %295 = vst [vmem:[#allocation2 + $0x38] sm:$0xff] %v256_v46  ;;  %v153_v48 = vadd.f32 %v152_v47, %v468_v27  ;;  %v259_v49 = vpop.f32.mrb[4].mxu1  ;;  %v154_v50 = vpop.f32.mrb[5].mxu0 }
  0xe6   :  { %v260_v51 = vadd.f32 %v259_v49, %v470_v28  ;;  %v155_v52 = vadd.f32 %v154_v50, %v472_v29  ;;  %v261_v53 = vpop.f32.mrb[5].mxu1 }
  0xe7   :  { %296 = vst [vmem:[#allocation2 + $0x40] sm:$0xff] %v153_v48  ;;  %v262_v54 = vadd.f32 %v261_v53, %v474_v30 }
  0xe8   :  { %298 = vst [vmem:[#allocation2 + $0x50] sm:$0xff] %v260_v51  ;;  %297 = vst [vmem:[#allocation2 + $0x48] sm:$0xff] %v155_v52  ;;  %v158_v55 = vpop.f32.mrb[6].mxu0 }
  0xe9   :  { %299 = vst [vmem:[#allocation2 + $0x58] sm:$0xff] %v262_v54  ;;  %v159_v56 = vadd.f32 %v158_v55, %v468_v27  ;;  %v265_v57 = vpop.f32.mrb[6].mxu1  ;;  %v160_v58 = vpop.f32.mrb[7].mxu0 }
  0xea   :  { %v266_v59 = vadd.f32 %v265_v57, %v470_v28  ;;  %v161_v60 = vadd.f32 %v160_v58, %v472_v29  ;;  %v267_v61 = vpop.f32.mrb[7].mxu1 }
  0xeb   :  { %300 = vst [vmem:[#allocation2 + $0x60] sm:$0xff] %v159_v56  ;;  %v268_v62 = vadd.f32 %v267_v61, %v474_v30 }
  0xec   :  { %302 = vst [vmem:[#allocation2 + $0x70] sm:$0xff] %v266_v59  ;;  %301 = vst [vmem:[#allocation2 + $0x68] sm:$0xff] %v161_v60  ;;  %v164_v63 = vpop.f32.mrb[8].mxu0 }
  0xed   :  { %303 = vst [vmem:[#allocation2 + $0x78] sm:$0xff] %v268_v62  ;;  %v165_v0 = vadd.f32 %v164_v63, %v468_v27  ;;  %v271_v1 = vpop.f32.mrb[8].mxu1  ;;  %v166_v2 = vpop.f32.mrb[9].mxu0 }
  0xee   :  { %v272_v3 = vadd.f32 %v271_v1, %v470_v28  ;;  %v167_v4 = vadd.f32 %v166_v2, %v472_v29  ;;  %v273_v5 = vpop.f32.mrb[9].mxu1 }
  0xef   :  { %304 = vst [vmem:[#allocation2 + $0x80] sm:$0xff] %v165_v0  ;;  %v274_v6 = vadd.f32 %v273_v5, %v474_v30 }
  0xf0   :  { %306 = vst [vmem:[#allocation2 + $0x90] sm:$0xff] %v272_v3  ;;  %305 = vst [vmem:[#allocation2 + $0x88] sm:$0xff] %v167_v4  ;;  %v170_v7 = vpop.f32.mrb[10].mxu0 }
  0xf1   :  { %307 = vst [vmem:[#allocation2 + $0x98] sm:$0xff] %v274_v6  ;;  %v171_v8 = vadd.f32 %v170_v7, %v468_v27  ;;  %v277_v9 = vpop.f32.mrb[10].mxu1  ;;  %v172_v10 = vpop.f32.mrb[11].mxu0 }
  0xf2   :  { %v278_v11 = vadd.f32 %v277_v9, %v470_v28  ;;  %v173_v12 = vadd.f32 %v172_v10, %v472_v29  ;;  %v279_v13 = vpop.f32.mrb[11].mxu1 }
  0xf3   :  { %308 = vst [vmem:[#allocation2 + $0xa0] sm:$0xff] %v171_v8  ;;  %v280_v14 = vadd.f32 %v279_v13, %v474_v30 }
  0xf4   :  { %310 = vst [vmem:[#allocation2 + $0xb0] sm:$0xff] %v278_v11  ;;  %309 = vst [vmem:[#allocation2 + $0xa8] sm:$0xff] %v173_v12  ;;  %v176_v15 = vpop.f32.mrb[12].mxu0 }
  0xf5   :  { %311 = vst [vmem:[#allocation2 + $0xb8] sm:$0xff] %v280_v14  ;;  %v177_v16 = vadd.f32 %v176_v15, %v468_v27  ;;  %v283_v17 = vpop.f32.mrb[12].mxu1  ;;  %v178_v18 = vpop.f32.mrb[13].mxu0 }
  0xf6   :  { %v284_v19 = vadd.f32 %v283_v17, %v470_v28  ;;  %v179_v20 = vadd.f32 %v178_v18, %v472_v29  ;;  %v285_v21 = vpop.f32.mrb[13].mxu1 }
  0xf7   :  { %312 = vst [vmem:[#allocation2 + $0xc0] sm:$0xff] %v177_v16  ;;  %v286_v22 = vadd.f32 %v285_v21, %v474_v30 }
  0xf8   :  { %314 = vst [vmem:[#allocation2 + $0xd0] sm:$0xff] %v284_v19  ;;  %313 = vst [vmem:[#allocation2 + $0xc8] sm:$0xff] %v179_v20 }
  0xf9   :  { %315 = vst [vmem:[#allocation2 + $0xd8] sm:$0xff] %v286_v22 }
  0xfa   :  { %369 = shalt.err (!%p366_p4)
}
  0xfb   :  { %s370_s19 = scalar_lea.hbm %s519_s3, 3584 }
  0xfc   :  { %p371_p5 = scmp.ne.s32.totalorder %s519_s3, %s370_s19  ;;  %p374_p6 = scmp.lt.u32.totalorder %s370_s19, %s519_s3 }
  0xfe   :  { %p376_p7 = pnand %p374_p6, %p371_p5 }
 0x100   :  { %379 = shalt.err (!%p376_p7)
}
 0x101   :  { %s384_s24 = smov 512   ;;  %s385_s25 = smov 32  }
 0x102   :  { %327 = dma.vmem_to_hbm [thread:$0]  %s322_s2, 3584, %s519_s3, [#allocation3], %s384_s24, %s384_s24, %s385_s25  }
 0x103   :  { %380 = dma.done.wait [#allocation3], 3584  }
 0x104   :  { %381 = vsyncadd [#allocation3], 4294963712 }
 0x105   :  { %331 = vsyncpa [#allocation3], 1 }

// kernel: tpu_custom_call.1
= control target key start
LH: loop header
LB: loop body
LE: loop exit
PB: predicated region body
PF: predicated region fallthrough
CT: control target
= control target key end

     0   :  { %v382_v7 = vmov 0.0   ;;  %vm52_vm0 = vcmask 130048   ;;  %s516_s0 = inlined_call_operand.vmem [shape: f32[56,16], index: 0, kind: input, shape index: {}]   ;;  %s517_s1 = inlined_call_operand.vmem [shape: f32[16,512], index: 1, kind: input, shape index: {}]   ;;  %s518_s2 = inlined_call_operand.vmem [shape: f32[1,512], index: 2, kind: input, shape index: {}]   ;;  %s519_s3 = inlined_call_operand.hbm [shape: f32[56,512], index: 3, kind: output, shape index: {}]  }
   0x1   :  { %v23_v0 = vld [vmem:[%s517_s1 + $0x8] sm:$0xff]  ;;  %v25_v2 = vld [vmem:[%s517_s1 + $0x18] sm:$0xff]  ;;  %v22_v5 = vld [vmem:[%s517_s1] sm:$0xff]  ;;  %138 = vmatprep.mubr.f32.mxu0 %v382_v7  ;;  %245 = vmatprep.mubr.f32.mxu1 %v382_v7 }
   0x2   :  { %v27_v1 = vld [vmem:[%s517_s1 + $0x28] sm:$0xff]  ;;  %v29_v4 = vld [vmem:[%s517_s1 + $0x38] sm:$0xff]  ;;  %v26_v6 = vld [vmem:[%s517_s1 + $0x20] sm:$0xff] }
   0x3   :  { %v346_v3 = vpack.c.bf16 %v27_v1, %v23_v0  ;;  %v350_v8 = vpack.c.bf16 %v29_v4, %v25_v2  ;;  %v348_v9 = vpack.c.bf16 %v26_v6, %v22_v5  ;;  %v24_v10 = vld [vmem:[%s517_s1 + $0x10] sm:$0xff]  ;;  %v15_v13 = vld [vmem:[%s516_s0] sm:$0xff] }
   0x4   :  { %v28_v11 = vld [vmem:[%s517_s1 + $0x30] sm:$0xff] }
   0x5   :  { %347 = vmatprep.subr.bf16.mxu0 %v346_v3  ;;  %v352_v12 = vpack.c.bf16 %v28_v11, %v24_v10  ;;  %351 = vmatprep.subr.bf16.mxu1 %v350_v8 }
   0x6   :  { %349 = vmatpush1.bf16.msra.mxu0 %v348_v9 }
   0x7   :  { %353 = vmatpush1.bf16.msra.mxu1 %v352_v12 }
   0x8   :  { %8 = vsyncpa [#allocation3], 0  ;;  %v16_v14 = vld [vmem:[%s516_s0 + $0x8] sm:$0xff]  ;;  %v17_v15 = vld [vmem:[%s516_s0 + $0x10] sm:$0xff]  ;;  %v32_v20 = vlaneseq }
   0x9   :  { %332 = vmatmul.mubr.msk.f32.vlgmr.msra.gmra.mrb[0].mxu0 %vm52_vm0, %v15_v13  ;;  %v18_v16 = vld [vmem:[%s516_s0 + $0x18] sm:$0xff]  ;;  %v19_v17 = vld [vmem:[%s516_s0 + $0x20] sm:$0xff]  ;;  %v20_v18 = vld [vmem:[%s516_s0 + $0x28] sm:$0xff] }
   0xa   :  { %339 = vmatmul.mubr.msk.f32.vlgmr.msra.gmra.mrb[0].mxu1 %vm52_vm0, %v15_v13  ;;  %144 = vmatprep.mubr.f32.mxu0 %v382_v7  ;;  %v21_v19 = vld [vmem:[%s516_s0 + $0x30] sm:$0xff]  ;;  %v33_v21 = vshrl.u32 %v32_v20, 7  ;;  %v30_v23 = vld [vmem:[%s518_s2] sm:$0xf]  ;;  %s383_s0 = smov [#allocation2]  }
   0xb   :  { %251 = vmatprep.mubr.f32.mxu1 %v382_v7  ;;  %s321_s2 = sshll.u32 %s383_s0, 4  ;;  %s322_s2 = int_to_ptr.vmem [resolvable:$true] %s321_s2 }
   0xc   :  { %v34_v22 = vsub.s32 0, %v33_v21  ;;  %v42_v24 = vsub.s32 2, %v33_v21  ;;  %v38_v25 = vsub.s32 1, %v33_v21  ;;  %v46_v26 = vsub.s32 3, %v33_v21  ;;  %s358_s16 = scalar_lea.vmem %s322_s2, 3584  ;;  %p363_p1 = scmp.lt.s32.totalorder %s322_s2, %s322_s2 }
   0xd   :  { %333 = vmatmul.mubr.msk.f32.gmra.mrb[2].mxu0 %vm52_vm0, %v16_v14  ;;  %p359_p0 = scmp.ne.s32.totalorder %s322_s2, %s358_s16  ;;  %p364_p2 = scmp.lt.s32.totalorder %s358_s16, %s358_s16 }
   0xe   :  { %340 = vmatmul.mubr.msk.f32.gmra.mrb[2].mxu1 %vm52_vm0, %v16_v14  ;;  %150 = vmatprep.mubr.f32.mxu0 %v382_v7  ;;  %v468_v27 = vrot.slane %v30_v23, %v34_v22  ;;  %v470_v28 = vrot.slane %v30_v23, %v42_v24  ;;  %v472_v29 = vrot.slane %v30_v23, %v38_v25 }
   0xf   :  { %257 = vmatprep.mubr.f32.mxu1 %v382_v7  ;;  %v474_v30 = vrot.slane %v30_v23, %v46_v26  ;;  %p365_p3 = por %p364_p2, %p363_p1 }
  0x11   :  { %334 = vmatmul.mubr.msk.f32.gmra.mrb[4].mxu0 %vm52_vm0, %v17_v15  ;;  %p366_p4 = pnand %p365_p3, %p359_p0 }
  0x12   :  { %341 = vmatmul.mubr.msk.f32.gmra.mrb[4].mxu1 %vm52_vm0, %v17_v15  ;;  %156 = vmatprep.mubr.f32.mxu0 %v382_v7 }
  0x13   :  { %263 = vmatprep.mubr.f32.mxu1 %v382_v7 }
  0x15   :  { %335 = vmatmul.mubr.msk.f32.gmra.mrb[6].mxu0 %vm52_vm0, %v18_v16 }
  0x16   :  { %342 = vmatmul.mubr.msk.f32.gmra.mrb[6].mxu1 %vm52_vm0, %v18_v16  ;;  %162 = vmatprep.mubr.f32.mxu0 %v382_v7 }
  0x17   :  { %269 = vmatprep.mubr.f32.mxu1 %v382_v7 }
  0x19   :  { %336 = vmatmul.mubr.msk.f32.gmra.mrb[8].mxu0 %vm52_vm0, %v19_v17 }
  0x1a   :  { %343 = vmatmul.mubr.msk.f32.gmra.mrb[8].mxu1 %vm52_vm0, %v19_v17  ;;  %168 = vmatprep.mubr.f32.mxu0 %v382_v7 }
  0x1b   :  { %275 = vmatprep.mubr.f32.mxu1 %v382_v7 }
  0x1d   :  { %337 = vmatmul.mubr.msk.f32.gmra.mrb[10].mxu0 %vm52_vm0, %v20_v18 }
  0x1e   :  { %344 = vmatmul.mubr.msk.f32.gmra.mrb[10].mxu1 %vm52_vm0, %v20_v18  ;;  %174 = vmatprep.mubr.f32.mxu0 %v382_v7 }
  0x1f   :  { %281 = vmatprep.mubr.f32.mxu1 %v382_v7 }
  0x21   :  { %338 = vmatmul.mubr.msk.f32.gmra.mrb[12].mxu0 %vm52_vm0, %v21_v19 }
  0x22   :  { %345 = vmatmul.mubr.msk.f32.gmra.mrb[12].mxu1 %vm52_vm0, %v21_v19 }
  0xdc   :  { %v140_v31 = vpop.f32.mrb[0].mxu0 }
  0xdd   :  { %v141_v32 = vadd.f32 %v140_v31, %v468_v27  ;;  %v247_v33 = vpop.f32.mrb[0].mxu1  ;;  %v142_v34 = vpop.f32.mrb[1].mxu0 }
  0xde   :  { %v248_v35 = vadd.f32 %v247_v33, %v470_v28  ;;  %v143_v36 = vadd.f32 %v142_v34, %v472_v29  ;;  %v249_v37 = vpop.f32.mrb[1].mxu1 }
  0xdf   :  { %288 = vst [vmem:[#allocation2] sm:$0xff] %v141_v32  ;;  %v250_v38 = vadd.f32 %v249_v37, %v474_v30 }
  0xe0   :  { %290 = vst [vmem:[#allocation2 + $0x10] sm:$0xff] %v248_v35  ;;  %289 = vst [vmem:[#allocation2 + $0x8] sm:$0xff] %v143_v36  ;;  %v146_v39 = vpop.f32.mrb[2].mxu0 }
  0xe1   :  { %291 = vst [vmem:[#allocation2 + $0x18] sm:$0xff] %v250_v38  ;;  %v147_v40 = vadd.f32 %v146_v39, %v468_v27  ;;  %v253_v41 = vpop.f32.mrb[2].mxu1  ;;  %v148_v42 = vpop.f32.mrb[3].mxu0 }
  0xe2   :  { %v254_v43 = vadd.f32 %v253_v41, %v470_v28  ;;  %v149_v44 = vadd.f32 %v148_v42, %v472_v29  ;;  %v255_v45 = vpop.f32.mrb[3].mxu1 }
  0xe3   :  { %292 = vst [vmem:[#allocation2 + $0x20] sm:$0xff] %v147_v40  ;;  %v256_v46 = vadd.f32 %v255_v45, %v474_v30 }
  0xe4   :  { %294 = vst [vmem:[#allocation2 + $0x30] sm:$0xff] %v254_v43  ;;  %293 = vst [vmem:[#allocation2 + $0x28] sm:$0xff] %v149_v44  ;;  %v152_v47 = vpop.f32.mrb[4].mxu0 }
  0xe5   :  { %295 = vst [vmem:[#allocation2 + $0x38] sm:$0xff] %v256_v46  ;;  %v153_v48 = vadd.f32 %v152_v47, %v468_v27  ;;  %v259_v49 = vpop.f32.mrb[4].mxu1  ;;  %v154_v50 = vpop.f32.mrb[5].mxu0 }
  0xe6   :  { %v260_v51 = vadd.f32 %v259_v49, %v470_v28  ;;  %v155_v52 = vadd.f32 %v154_v50, %v472_v29  ;;  %v261_v53 = vpop.f32.mrb[5].mxu1 }
  0xe7   :  { %296 = vst [vmem:[#allocation2 + $0x40] sm:$0xff] %v153_v48  ;;  %v262_v54 = vadd.f32 %v261_v53, %v474_v30 }
  0xe8   :  { %298 = vst [vmem:[#allocation2 + $0x50] sm:$0xff] %v260_v51  ;;  %297 = vst [vmem:[#allocation2 + $0x48] sm:$0xff] %v155_v52  ;;  %v158_v55 = vpop.f32.mrb[6].mxu0 }
  0xe9   :  { %299 = vst [vmem:[#allocation2 + $0x58] sm:$0xff] %v262_v54  ;;  %v159_v56 = vadd.f32 %v158_v55, %v468_v27  ;;  %v265_v57 = vpop.f32.mrb[6].mxu1  ;;  %v160_v58 = vpop.f32.mrb[7].mxu0 }
  0xea   :  { %v266_v59 = vadd.f32 %v265_v57, %v470_v28  ;;  %v161_v60 = vadd.f32 %v160_v58, %v472_v29  ;;  %v267_v61 = vpop.f32.mrb[7].mxu1 }
  0xeb   :  { %300 = vst [vmem:[#allocation2 + $0x60] sm:$0xff] %v159_v56  ;;  %v268_v62 = vadd.f32 %v267_v61, %v474_v30 }
  0xec   :  { %302 = vst [vmem:[#allocation2 + $0x70] sm:$0xff] %v266_v59  ;;  %301 = vst [vmem:[#allocation2 + $0x68] sm:$0xff] %v161_v60  ;;  %v164_v63 = vpop.f32.mrb[8].mxu0 }
  0xed   :  { %303 = vst [vmem:[#allocation2 + $0x78] sm:$0xff] %v268_v62  ;;  %v165_v0 = vadd.f32 %v164_v63, %v468_v27  ;;  %v271_v1 = vpop.f32.mrb[8].mxu1  ;;  %v166_v2 = vpop.f32.mrb[9].mxu0 }
  0xee   :  { %v272_v3 = vadd.f32 %v271_v1, %v470_v28  ;;  %v167_v4 = vadd.f32 %v166_v2, %v472_v29  ;;  %v273_v5 = vpop.f32.mrb[9].mxu1 }
  0xef   :  { %304 = vst [vmem:[#allocation2 + $0x80] sm:$0xff] %v165_v0  ;;  %v274_v6 = vadd.f32 %v273_v5, %v474_v30 }
  0xf0   :  { %306 = vst [vmem:[#allocation2 + $0x90] sm:$0xff] %v272_v3  ;;  %305 = vst [vmem:[#allocation2 + $0x88] sm:$0xff] %v167_v4  ;;  %v170_v7 = vpop.f32.mrb[10].mxu0 }
  0xf1   :  { %307 = vst [vmem:[#allocation2 + $0x98] sm:$0xff] %v274_v6  ;;  %v171_v8 = vadd.f32 %v170_v7, %v468_v27  ;;  %v277_v9 = vpop.f32.mrb[10].mxu1  ;;  %v172_v10 = vpop.f32.mrb[11].mxu0 }
  0xf2   :  { %v278_v11 = vadd.f32 %v277_v9, %v470_v28  ;;  %v173_v12 = vadd.f32 %v172_v10, %v472_v29  ;;  %v279_v13 = vpop.f32.mrb[11].mxu1 }
  0xf3   :  { %308 = vst [vmem:[#allocation2 + $0xa0] sm:$0xff] %v171_v8  ;;  %v280_v14 = vadd.f32 %v279_v13, %v474_v30 }
  0xf4   :  { %310 = vst [vmem:[#allocation2 + $0xb0] sm:$0xff] %v278_v11  ;;  %309 = vst [vmem:[#allocation2 + $0xa8] sm:$0xff] %v173_v12  ;;  %v176_v15 = vpop.f32.mrb[12].mxu0 }
  0xf5   :  { %311 = vst [vmem:[#allocation2 + $0xb8] sm:$0xff] %v280_v14  ;;  %v177_v16 = vadd.f32 %v176_v15, %v468_v27  ;;  %v283_v17 = vpop.f32.mrb[12].mxu1  ;;  %v178_v18 = vpop.f32.mrb[13].mxu0 }
  0xf6   :  { %v284_v19 = vadd.f32 %v283_v17, %v470_v28  ;;  %v179_v20 = vadd.f32 %v178_v18, %v472_v29  ;;  %v285_v21 = vpop.f32.mrb[13].mxu1 }
  0xf7   :  { %312 = vst [vmem:[#allocation2 + $0xc0] sm:$0xff] %v177_v16  ;;  %v286_v22 = vadd.f32 %v285_v21, %v474_v30 }
  0xf8   :  { %314 = vst [vmem:[#allocation2 + $0xd0] sm:$0xff] %v284_v19  ;;  %313 = vst [vmem:[#allocation2 + $0xc8] sm:$0xff] %v179_v20 }
  0xf9   :  { %315 = vst [vmem:[#allocation2 + $0xd8] sm:$0xff] %v286_v22 }
  0xfa   :  { %369 = shalt.err (!%p366_p4)
}
  0xfb   :  { %s370_s19 = scalar_lea.hbm %s519_s3, 3584 }
  0xfc   :  { %p371_p5 = scmp.ne.s32.totalorder %s519_s3, %s370_s19  ;;  %p374_p6 = scmp.lt.u32.totalorder %s370_s19, %s519_s3 }
  0xfe   :  { %p376_p7 = pnand %p374_p6, %p371_p5 }
 0x100   :  { %379 = shalt.err (!%p376_p7)
}
 0x101   :  { %s384_s24 = smov 512   ;;  %s385_s25 = smov 32  }
 0x102   :  { %327 = dma.vmem_to_hbm [thread:$0]  %s322_s2, 3584, %s519_s3, [#allocation3], %s384_s24, %s384_s24, %s385_s25  }
 0x103   :  { %380 = dma.done.wait [#allocation3], 3584  }
 0x104   :  { %381 = vsyncadd [#allocation3], 4294963712 }
 0x105   :  { %331 = vsyncpa [#allocation3], 1 }

</bundles_post_ra>
